<compile_context>
chip_gen: v7x
topology: tpu7x:2x2x1
jax: 0.10.0
libtpu: 0.0.40
codegen_flags: <defaults>
</compile_context>

<pallas_src>
import functools

import numpy as np
import jax
import jax.numpy as jnp
from jax.experimental import pallas as pl
from jax.experimental.pallas import tpu as pltpu


def _round_up(a, b):
    return ((a + b - 1) // b) * b


def _bf16_exact(bit_size, es_size):
    """True if every posit(bit_size, es_size) value is exactly a bfloat16."""
    frac_bits = bit_size - 3 - es_size            # max fraction bits of the format
    maxpos_exp = (bit_size - 2) * (1 << es_size)  # |exponent| bound
    return frac_bits <= 7 and maxpos_exp <= 126


# ----------------------------- posit quantization ---------------------------

def _pow2_f32(e_int):
    """Exact 2**e for int32 e, built from the float32 bit pattern."""
    e_cl = jnp.clip(e_int, -126, 127)
    return pltpu.bitcast((e_cl + 127) << 23, jnp.float32)


def _posit_quantize(x, bit_size, es_size):
    """Round each float32 element to the nearest posit(bit_size, es_size) value."""
    two_es = 1 << es_size
    maxpos_exp = (bit_size - 2) * two_es
    maxpos = float(2.0 ** maxpos_exp)
    minpos = float(2.0 ** (-maxpos_exp))
    maxpos_bits = int(np.float32(maxpos).view(np.int32))
    # TODO(synk): for very wide posit formats (maxpos_exp > 126) minpos/maxpos
    # are not f32-representable and path B's endpoints saturate; fine for the
    # narrow formats this layer targets (e.g. posit(8,1)).

    xbits = pltpu.bitcast(x, jnp.int32)
    sign_bits = xbits & jnp.int32(-2147483648)      # 0x80000000
    a = jnp.abs(x)
    a_c = jnp.clip(a, minpos, maxpos)               # posit never rounds to 0/inf

    bits = pltpu.bitcast(a_c, jnp.int32)
    e_total = ((bits >> 23) & 0xFF) - 127           # floor(log2(a_c)); a_c is normal
    k = e_total >> es_size                          # regime value
    e = e_total - (k << es_size)                    # exponent field in [0, 2**es)
    regime_len = jnp.where(k >= 0, k + 2, 1 - k)
    rem = (bit_size - 1) - regime_len               # bits left for exponent+fraction
    fbits = rem - es_size                           # fraction bits (may be < 0)

    # Path A: fraction bits available -> round the f32 mantissa in the integer
    # domain (add half an ULP of the target grid, then mask).  No pow2 muls.
    shift_r = 23 - jnp.clip(fbits, 0, 23)
    half = (jnp.int32(1) << shift_r) >> 1
    keep = ~((jnp.int32(1) << shift_r) - 1)
    qa_bits = (bits + half) & keep

    # Path B: exponent field (partially) truncated -> neighbours are powers of 2.
    rem_c = jnp.clip(rem, 0, es_size)
    shift = es_size - rem_c
    e_lo = (e >> shift) << shift
    lo_exp = k * two_es + e_lo
    lo = _pow2_f32(lo_exp)
    hi = _pow2_f32(lo_exp + (jnp.int32(1) << shift))
    qb_bits = pltpu.bitcast(jnp.where(2.0 * a_c < lo + hi, lo, hi), jnp.int32)

    # TODO(synk): tie-breaking of the original floatTensor_to_positTensor is
    # unknown; path A rounds ties away from zero, path B rounds ties upward.
    q_bits = jnp.where(fbits >= 0, qa_bits, qb_bits)
    q_bits = jnp.where(rem < 0, jnp.int32(maxpos_bits), q_bits)
    out = pltpu.bitcast(q_bits | sign_bits, jnp.float32)
    return jnp.where(a == 0.0, jnp.float32(0.0), out)


def _positize_kernel(x_ref, o_ref, *, bit_size, es_size):
    o_ref[...] = _posit_quantize(x_ref[...], bit_size, es_size).astype(o_ref.dtype)


def positize(x, bit_size, es_size, out_dtype=jnp.float32,
             *, lane=1024, max_rows=512):
    """Elementwise posit quantization via a tiled Pallas kernel (any shape)."""
    orig_shape = x.shape
    flat = jnp.ravel(x).astype(jnp.float32)
    n = flat.shape[0]
    rows = max(1, -(-n // lane))
    tile_rows = min(max_rows, _round_up(rows, 8))
    rows_pad = _round_up(rows, tile_rows)
    total = rows_pad * lane
    flat = jnp.pad(flat, (0, total - n))
    x2d = flat.reshape(rows_pad, lane)
    out = pl.pallas_call(
        functools.partial(_positize_kernel, bit_size=bit_size, es_size=es_size),
        out_shape=jax.ShapeDtypeStruct((rows_pad, lane), out_dtype),
        grid=(rows_pad // tile_rows,),
        in_specs=[pl.BlockSpec((tile_rows, lane), lambda i: (i, 0))],
        out_specs=pl.BlockSpec((tile_rows, lane), lambda i: (i, 0)),
        compiler_params=pltpu.CompilerParams(dimension_semantics=("parallel",)),
    )(x2d)
    return out.reshape(-1)[:n].reshape(orig_shape)


# --------------------------- implicit-GEMM conv2d ----------------------------

def _conv_kernel(x_ref, w_ref, b_ref, o_ref, *, offsets, tile_m):
    """Implicit-GEMM convolution for one image.

    x_ref : (1, R, C)     flattened, spatially padded NHWC rows (+ K-1 pad rows)
    w_ref : (K*K, C, OC)  per-tap weight slices in the matmul dtype
    b_ref : (1, OC)       float32 bias
    o_ref : (1, M, OC)    float32 output rows, M = (H_pad - K + 1) * W_pad
    """
    m_total = o_ref.shape[1]
    oc = o_ref.shape[2]
    mm_dtype = w_ref.dtype
    bias = b_ref[...]                                    # (1, OC) f32

    m0 = 0
    while m0 < m_total:                                  # static Python chunking
        tm = min(tile_m, m_total - m0)
        acc = jnp.zeros((tm, oc), jnp.float32)
        for i, d in enumerate(offsets):                  # K*K taps, static offsets
            xs = x_ref[0, m0 + d:m0 + d + tm, :].astype(mm_dtype)
            acc = acc + jnp.dot(xs, w_ref[i],
                                preferred_element_type=jnp.float32)
        o_ref[0, m0:m0 + tm, :] = (acc + bias).astype(o_ref.dtype)
        m0 += tm


def conv2d_implicit_gemm(xq_nhwc, w_taps, bias2d, *, kernel_size, stride,
                         padding, tile_m=256):
    """Conv2d of a quantized NHWC activation against pre-packed weight taps.

    Output rows are computed at stride 1 over the full padded width (garbage
    right-edge columns included) so every tap is a contiguous row shift; the
    valid (OH, OW) grid is sliced out afterwards.
    TODO(synk): stride > 1 over-computes by ~stride^2 and is then subsampled.
    """
    n, h, w, c = xq_nhwc.shape
    kk, c2, oc = w_taps.shape
    ksz = kernel_size
    assert kk == ksz * ksz and c2 == c
    h_pad, w_pad = h + 2 * padding, w + 2 * padding
    oh = (h_pad - ksz) // stride + 1
    ow = (w_pad - ksz) // stride + 1
    ohf = h_pad - ksz + 1                       # stride-1 row count
    m_full = ohf * w_pad
    r = h_pad * w_pad + (ksz - 1)               # extra rows so the last tap fits

    xp = jnp.pad(xq_nhwc, ((0, 0), (padding, padding), (padding, padding), (0, 0)))
    xrows = jnp.pad(xp.reshape(n, h_pad * w_pad, c), ((0, 0), (0, ksz - 1), (0, 0)))
    offsets = tuple(kh * w_pad + kw for kh in range(ksz) for kw in range(ksz))

    y_rows = pl.pallas_call(
        functools.partial(_conv_kernel, offsets=offsets, tile_m=tile_m),
        out_shape=jax.ShapeDtypeStruct((n, m_full, oc), jnp.float32),
        grid=(n,),
        in_specs=[
            pl.BlockSpec((1, r, c), lambda i: (i, 0, 0)),
            pl.BlockSpec((kk, c, oc), lambda i: (0, 0, 0)),   # resident weights
            pl.BlockSpec((1, oc), lambda i: (0, 0)),          # resident bias
        ],
        out_specs=pl.BlockSpec((1, m_full, oc), lambda i: (i, 0, 0)),
        compiler_params=pltpu.CompilerParams(dimension_semantics=("parallel",)),
    )(xrows, w_taps, bias2d)

    y = y_rows.reshape(n, ohf, w_pad, oc)
    y = y[:, ::stride, ::stride, :][:, :oh, :ow, :]
    return y                                   # NHWC


# ------------------------------- the module ----------------------------------

class PositizedConv2d:
    def __init__(self, input_channel, output_channel, kernel_size, bit_size,
                 es_size, stride=1, padding=0, *, key):
        self.stride = stride
        self.padding = padding
        self.kernel_size = kernel_size
        self.bit_size = bit_size
        self.es_size = es_size

        wkey, bkey = jax.random.split(key)
        fan_in = input_channel * kernel_size * kernel_size
        bound = 1.0 / float(np.sqrt(fan_in))
        self.weight = jax.random.uniform(
            wkey, (output_channel, input_channel, kernel_size, kernel_size),
            jnp.float32, -bound, bound)
        self.bias = jax.random.uniform(bkey, (output_channel,), jnp.float32,
                                       -bound, bound)

        # bf16 MXU operands are exact for narrow posit formats (e.g. posit(8,1)).
        # TODO(synk): for wide formats (_mm_dtype == f32) a bf16 hi/lo split
        # matmul would recover MXU throughput; a plain f32 dot is used instead.
        self._mm_dtype = jnp.bfloat16 if _bf16_exact(bit_size, es_size) else jnp.float32

        # Quantize and pack the weights once: (OC, C, K, K) -> (K*K, C, OC) taps.
        self.weight_q = positize(self.weight, bit_size, es_size)
        self._w_taps = (self.weight_q.transpose(2, 3, 1, 0)
                        .reshape(kernel_size * kernel_size,
                                 input_channel, output_channel)
                        .astype(self._mm_dtype))
        self._bias2d = self.bias.reshape(1, output_channel).astype(jnp.float32)

    def __call__(self, x):                       # x: (N, C, H, W) float32
        # Quantize in NHWC so the implicit-GEMM gather is along the lane axis.
        xq = positize(jnp.transpose(x, (0, 2, 3, 1)), self.bit_size, self.es_size)
        y_nhwc = conv2d_implicit_gemm(
            xq, self._w_taps, self._bias2d,
            kernel_size=self.kernel_size, stride=self.stride,
            padding=self.padding)
        return jnp.transpose(y_nhwc, (0, 3, 1, 2))       # back to NCHW


# ----------------------------------- main -------------------------------------

if __name__ == "__main__":
    key = jax.random.PRNGKey(0)
    xkey, mkey = jax.random.split(key)
    N, C, H, W = 2, 4, 16, 16
    OC, K = 8, 3
    bit_size, es_size = 8, 1

    x = jax.random.normal(xkey, (N, C, H, W), jnp.float32)
    module = PositizedConv2d(C, OC, K, bit_size, es_size, stride=1, padding=1,
                             key=mkey)

    y = jax.block_until_ready(module(x))
    assert y.shape == (N, OC, H, W)

    # sanity: posit(8,1) quantization of known values
    vals = jax.block_until_ready(
        positize(jnp.array([0.0, 1.0, 3.7, -3.7, 100.0, 1e6], jnp.float32), 8, 1))
    np.testing.assert_allclose(
        np.asarray(vals),
        np.array([0.0, 1.0, 3.75, -3.75, 96.0, 4096.0], np.float32))

    # reference: XLA conv applied to the same positized operands + float bias
    xq = positize(x, bit_size, es_size)
    wq = positize(module.weight, bit_size, es_size)
    ref = jax.lax.conv_general_dilated(
        xq, wq, window_strides=(1, 1), padding=((1, 1), (1, 1)),
        dimension_numbers=("NCHW", "OIHW", "NCHW")) + module.bias[None, :, None, None]
    np.testing.assert_allclose(np.asarray(y), np.asarray(ref), rtol=2e-2, atol=2e-2)

    print("KERNEL_OK")
</pallas_src>

<mosaic_0001>
module attributes {stable_mosaic.version = 11 : i64} {
  func.func @_positize_kernel(%arg0: i32, %arg1: memref<8x1024xf32, #tpu.memory_space<vmem>>, %arg2: memref<8x1024xf32, #tpu.memory_space<vmem>>) attributes {dimension_semantics = [#tpu.dimension_semantics<parallel>], iteration_bounds = array<i64: 1>, scalar_prefetch = 0 : i64, scratch_operands = 0 : i64, tpu.core_type = #tpu.core_type<tc>, window_params = [{transform_indices = @transform_0, window_bounds = array<i64: 8, 1024>}, {transform_indices = @transform_1, window_bounds = array<i64: 8, 1024>}]} {
    %c0 = arith.constant 0 : index
    %c0_0 = arith.constant 0 : index
    %0 = vector.load %arg1[%c0, %c0_0] : memref<8x1024xf32, #tpu.memory_space<vmem>>, vector<8x1024xf32>
    %1 = tpu.bitcast %0 : vector<8x1024xf32> -> vector<8x1024xi32>
    %c-2147483648_i32 = arith.constant -2147483648 : i32
    %2 = vector.broadcast %c-2147483648_i32 : i32 to vector<8x1024xi32>
    %3 = arith.andi %1, %2 : vector<8x1024xi32>
    %4 = math.absf %0 : vector<8x1024xf32>
    %cst = arith.constant 2.44140625E-4 : f32
    %cst_1 = arith.constant 4.096000e+03 : f32
    %5 = vector.broadcast %cst : f32 to vector<8x1024xf32>
    %6 = arith.maximumf %5, %4 : vector<8x1024xf32>
    %7 = vector.broadcast %cst_1 : f32 to vector<8x1024xf32>
    %8 = arith.minimumf %7, %6 : vector<8x1024xf32>
    %9 = tpu.bitcast %8 : vector<8x1024xf32> -> vector<8x1024xi32>
    %c23_i32 = arith.constant 23 : i32
    %10 = vector.broadcast %c23_i32 : i32 to vector<8x1024xi32>
    %11 = arith.shrsi %9, %10 : vector<8x1024xi32>
    %c255_i32 = arith.constant 255 : i32
    %12 = vector.broadcast %c255_i32 : i32 to vector<8x1024xi32>
    %13 = arith.andi %11, %12 : vector<8x1024xi32>
    %c127_i32 = arith.constant 127 : i32
    %14 = vector.broadcast %c127_i32 : i32 to vector<8x1024xi32>
    %15 = arith.subi %13, %14 : vector<8x1024xi32>
    %c1_i32 = arith.constant 1 : i32
    %16 = vector.broadcast %c1_i32 : i32 to vector<8x1024xi32>
    %17 = arith.shrsi %15, %16 : vector<8x1024xi32>
    %c1_i32_2 = arith.constant 1 : i32
    %18 = vector.broadcast %c1_i32_2 : i32 to vector<8x1024xi32>
    %19 = arith.shli %17, %18 : vector<8x1024xi32>
    %20 = arith.subi %15, %19 : vector<8x1024xi32>
    %c0_i32 = arith.constant 0 : i32
    %21 = vector.broadcast %c0_i32 : i32 to vector<8x1024xi32>
    %22 = arith.cmpi sge, %17, %21 : vector<8x1024xi32>
    %c2_i32 = arith.constant 2 : i32
    %23 = vector.broadcast %c2_i32 : i32 to vector<8x1024xi32>
    %24 = arith.addi %17, %23 : vector<8x1024xi32>
    %c1_i32_3 = arith.constant 1 : i32
    %25 = vector.broadcast %c1_i32_3 : i32 to vector<8x1024xi32>
    %26 = arith.subi %25, %17 : vector<8x1024xi32>
    %27 = arith.select %22, %24, %26 : vector<8x1024xi1>, vector<8x1024xi32>
    %c7_i32 = arith.constant 7 : i32
    %28 = vector.broadcast %c7_i32 : i32 to vector<8x1024xi32>
    %29 = arith.subi %28, %27 : vector<8x1024xi32>
    %c1_i32_4 = arith.constant 1 : i32
    %30 = vector.broadcast %c1_i32_4 : i32 to vector<8x1024xi32>
    %31 = arith.subi %29, %30 : vector<8x1024xi32>
    %c0_i32_5 = arith.constant 0 : i32
    %c23_i32_6 = arith.constant 23 : i32
    %32 = vector.broadcast %c0_i32_5 : i32 to vector<8x1024xi32>
    %33 = arith.maxsi %32, %31 : vector<8x1024xi32>
    %34 = vector.broadcast %c23_i32_6 : i32 to vector<8x1024xi32>
    %35 = arith.minsi %34, %33 : vector<8x1024xi32>
    %c23_i32_7 = arith.constant 23 : i32
    %36 = vector.broadcast %c23_i32_7 : i32 to vector<8x1024xi32>
    %37 = arith.subi %36, %35 : vector<8x1024xi32>
    %c1_i32_8 = arith.constant 1 : i32
    %38 = vector.broadcast %c1_i32_8 : i32 to vector<8x1024xi32>
    %39 = arith.shli %38, %37 : vector<8x1024xi32>
    %c1_i32_9 = arith.constant 1 : i32
    %40 = vector.broadcast %c1_i32_9 : i32 to vector<8x1024xi32>
    %41 = arith.shrsi %39, %40 : vector<8x1024xi32>
    %c1_i32_10 = arith.constant 1 : i32
    %42 = vector.broadcast %c1_i32_10 : i32 to vector<8x1024xi32>
    %43 = arith.shli %42, %37 : vector<8x1024xi32>
    %c1_i32_11 = arith.constant 1 : i32
    %44 = vector.broadcast %c1_i32_11 : i32 to vector<8x1024xi32>
    %45 = arith.subi %43, %44 : vector<8x1024xi32>
    %cst_12 = arith.constant dense<-1> : vector<8x1024xi32>
    %46 = arith.xori %45, %cst_12 : vector<8x1024xi32>
    %47 = arith.addi %9, %41 : vector<8x1024xi32>
    %48 = arith.andi %47, %46 : vector<8x1024xi32>
    %c0_i32_13 = arith.constant 0 : i32
    %c1_i32_14 = arith.constant 1 : i32
    %49 = vector.broadcast %c0_i32_13 : i32 to vector<8x1024xi32>
    %50 = arith.maxsi %49, %29 : vector<8x1024xi32>
    %51 = vector.broadcast %c1_i32_14 : i32 to vector<8x1024xi32>
    %52 = arith.minsi %51, %50 : vector<8x1024xi32>
    %c1_i32_15 = arith.constant 1 : i32
    %53 = vector.broadcast %c1_i32_15 : i32 to vector<8x1024xi32>
    %54 = arith.subi %53, %52 : vector<8x1024xi32>
    %55 = arith.shrsi %20, %54 : vector<8x1024xi32>
    %56 = arith.shli %55, %54 : vector<8x1024xi32>
    %c2_i32_16 = arith.constant 2 : i32
    %57 = vector.broadcast %c2_i32_16 : i32 to vector<8x1024xi32>
    %58 = arith.muli %17, %57 : vector<8x1024xi32>
    %59 = arith.addi %58, %56 : vector<8x1024xi32>
    %c-126_i32 = arith.constant -126 : i32
    %c127_i32_17 = arith.constant 127 : i32
    %60 = vector.broadcast %c-126_i32 : i32 to vector<8x1024xi32>
    %61 = arith.maxsi %60, %59 : vector<8x1024xi32>
    %62 = vector.broadcast %c127_i32_17 : i32 to vector<8x1024xi32>
    %63 = arith.minsi %62, %61 : vector<8x1024xi32>
    %c127_i32_18 = arith.constant 127 : i32
    %64 = vector.broadcast %c127_i32_18 : i32 to vector<8x1024xi32>
    %65 = arith.addi %63, %64 : vector<8x1024xi32>
    %c23_i32_19 = arith.constant 23 : i32
    %66 = vector.broadcast %c23_i32_19 : i32 to vector<8x1024xi32>
    %67 = arith.shli %65, %66 : vector<8x1024xi32>
    %68 = tpu.bitcast %67 : vector<8x1024xi32> -> vector<8x1024xf32>
    %c1_i32_20 = arith.constant 1 : i32
    %69 = vector.broadcast %c1_i32_20 : i32 to vector<8x1024xi32>
    %70 = arith.shli %69, %54 : vector<8x1024xi32>
    %71 = arith.addi %59, %70 : vector<8x1024xi32>
    %c-126_i32_21 = arith.constant -126 : i32
    %c127_i32_22 = arith.constant 127 : i32
    %72 = vector.broadcast %c-126_i32_21 : i32 to vector<8x1024xi32>
    %73 = arith.maxsi %72, %71 : vector<8x1024xi32>
    %74 = vector.broadcast %c127_i32_22 : i32 to vector<8x1024xi32>
    %75 = arith.minsi %74, %73 : vector<8x1024xi32>
    %c127_i32_23 = arith.constant 127 : i32
    %76 = vector.broadcast %c127_i32_23 : i32 to vector<8x1024xi32>
    %77 = arith.addi %75, %76 : vector<8x1024xi32>
    %c23_i32_24 = arith.constant 23 : i32
    %78 = vector.broadcast %c23_i32_24 : i32 to vector<8x1024xi32>
    %79 = arith.shli %77, %78 : vector<8x1024xi32>
    %80 = tpu.bitcast %79 : vector<8x1024xi32> -> vector<8x1024xf32>
    %cst_25 = arith.constant 2.000000e+00 : f32
    %81 = vector.broadcast %cst_25 : f32 to vector<8x1024xf32>
    %82 = arith.mulf %81, %8 : vector<8x1024xf32>
    %83 = arith.addf %68, %80 : vector<8x1024xf32>
    %84 = arith.cmpf olt, %82, %83 : vector<8x1024xf32>
    %85 = arith.select %84, %68, %80 : vector<8x1024xi1>, vector<8x1024xf32>
    %86 = tpu.bitcast %85 : vector<8x1024xf32> -> vector<8x1024xi32>
    %c0_i32_26 = arith.constant 0 : i32
    %87 = vector.broadcast %c0_i32_26 : i32 to vector<8x1024xi32>
    %88 = arith.cmpi sge, %31, %87 : vector<8x1024xi32>
    %89 = arith.select %88, %48, %86 : vector<8x1024xi1>, vector<8x1024xi32>
    %c0_i32_27 = arith.constant 0 : i32
    %90 = vector.broadcast %c0_i32_27 : i32 to vector<8x1024xi32>
    %91 = arith.cmpi slt, %29, %90 : vector<8x1024xi32>
    %c1166016512_i32 = arith.constant 1166016512 : i32
    %92 = vector.broadcast %c1166016512_i32 : i32 to vector<8x1024xi32>
    %93 = arith.select %91, %92, %89 : vector<8x1024xi1>, vector<8x1024xi32>
    %94 = arith.ori %93, %3 : vector<8x1024xi32>
    %95 = tpu.bitcast %94 : vector<8x1024xi32> -> vector<8x1024xf32>
    %cst_28 = arith.constant 0.000000e+00 : f32
    %96 = vector.broadcast %cst_28 : f32 to vector<8x1024xf32>
    %97 = arith.cmpf oeq, %4, %96 : vector<8x1024xf32>
    %cst_29 = arith.constant 0.000000e+00 : f32
    %98 = vector.broadcast %cst_29 : f32 to vector<8x1024xf32>
    %99 = arith.select %97, %98, %95 : vector<8x1024xi1>, vector<8x1024xf32>
    %c0_30 = arith.constant 0 : index
    %c0_31 = arith.constant 0 : index
    %100 = vector.load %arg2[%c0_30, %c0_31] : memref<8x1024xf32, #tpu.memory_space<vmem>>, vector<8x1024xf32>
    tpu.vector_store %arg2[%c0_30, %c0_31], %99 {strides = array<i32>} : memref<8x1024xf32, #tpu.memory_space<vmem>>, vector<8x1024xf32>,
    return
  }
  func.func @transform_0(%arg0: i32) -> (i32, i32) {
    %c0_i32 = arith.constant 0 : i32
    %c0_i32_0 = arith.constant 0 : i32
    return %arg0, %c0_i32 : i32, i32
  }
  func.func @transform_1(%arg0: i32) -> (i32, i32) {
    %c0_i32 = arith.constant 0 : i32
    %c0_i32_0 = arith.constant 0 : i32
    return %arg0, %c0_i32 : i32, i32
  }
}

</mosaic_0001>

<bundles_post_ra>
// kernel: tpu_custom_call.1
= control target key start
LH: loop header
LB: loop body
LE: loop exit
PB: predicated region body
PF: predicated region fallthrough
CT: control target
= control target key end

     0   :  { %6 = vsyncpa [#allocation3], 0  ;;  %s1058_s0 = inlined_call_operand.hbm [shape: f32[8,1024], index: 0, kind: input, shape index: {}]   ;;  %s1059_s1 = inlined_call_operand.hbm [shape: f32[8,1024], index: 1, kind: output, shape index: {}]  }
   0x1   :  { %7 = vsyncpa [#allocation4], 0  ;;  %s671_s6 = smov [#allocation2]   ;;  %s623_s10 = scalar_lea.hbm %s1058_s0, 1024 }
   0x2   :  { %s14_s7 = sshll.u32 %s671_s6, 4  ;;  %p624_p0 = scmp.ne.s32.totalorder %s1058_s0, %s623_s10  ;;  %s15_s7 = int_to_ptr.vmem [resolvable:$true] %s14_s7 }
   0x3   :  { %p627_p1 = scmp.lt.u32.totalorder %s623_s10, %s1058_s0 }
   0x5   :  { %p629_p2 = pnand %p627_p1, %p624_p0 }
   0x7   :  { %632 = shalt.err (!%p629_p2)
}
   0x8   :  { %s633_s15 = scalar_lea.vmem %s15_s7, 1024  ;;  %p638_p4 = scmp.lt.s32.totalorder %s15_s7, %s15_s7 }
   0x9   :  { %p634_p3 = scmp.ne.s32.totalorder %s15_s7, %s633_s15  ;;  %p639_p5 = scmp.lt.s32.totalorder %s633_s15, %s633_s15 }
   0xb   :  { %p640_p6 = por %p639_p5, %p638_p4 }
   0xd   :  { %p641_p7 = pnand %p640_p6, %p634_p3 }
   0xf   :  { %644 = shalt.err (!%p641_p7)
}
  0x10   :  { %17 = dma.hbm_to_vmem [thread:$0]  %s1058_s0, 1024, %s15_s7, [#allocation3]  }
  0x11   :  { %667 = dma.done.wait [#allocation3], 1024  }
  0x12   :  { %668 = vsyncadd [#allocation3], 4294966272  ;;  %v696_v0 = vld [vmem:[#allocation2] sm:$0xff]  ;;  %v698_v1 = vld [vmem:[#allocation2 + $0x8] sm:$0xff]  ;;  %s673_s0 = smov [#allocation5]  }
  0x13   :  { %v700_v2 = vld [vmem:[#allocation2 + $0x10] sm:$0xff]  ;;  %v45_v3 = vand.u32 2147483647, %v696_v0  ;;  %v46_v4 = vand.u32 2147483647, %v698_v1  ;;  %v705_v6 = vld [vmem:[#allocation2 + $0x18] sm:$0xff] }
  0x14   :  { %v47_v5 = vand.u32 2147483647, %v700_v2  ;;  %v711_v9 = vld [vmem:[#allocation2 + $0x20] sm:$0xff]  ;;  %v48_v11 = vand.u32 2147483647, %v705_v6  ;;  %v733_v28 = vld [vmem:[#allocation2 + $0x28] sm:$0xff] }
  0x15   :  { %v53_v7 = vmax.f32 %v45_v3, 0.00024414063  ;;  %v54_v8 = vmax.f32 %v46_v4, 0.00024414063  ;;  %v49_v16 = vand.u32 2147483647, %v711_v9  ;;  %v37_v30 = vand.u32 2147483648, %v696_v0  ;;  %s579_s18 = sshll.u32 %s673_s0, 4  ;;  %s580_s18 = int_to_ptr.vmem [resolvable:$true] %s579_s18 }
  0x16   :  { %v55_v10 = vmax.f32 %v47_v5, 0.00024414063  ;;  %v56_v15 = vmax.f32 %v48_v11, 0.00024414063  ;;  %v38_v32 = vand.u32 2147483648, %v698_v1  ;;  %v39_v34 = vand.u32 2147483648, %v700_v2  ;;  %s645_s19 = scalar_lea.vmem %s580_s18, 1024  ;;  %p650_p9 = scmp.lt.s32.totalorder %s580_s18, %s580_s18 }
  0x17   :  { %v716_v12 = vmin.f32 %v53_v7, 4096.0  ;;  %v718_v13 = vmin.f32 %v54_v8, 4096.0  ;;  %v57_v25 = vmax.f32 %v49_v16, 0.00024414063  ;;  %v50_v37 = vand.u32 2147483647, %v733_v28  ;;  %p646_p8 = scmp.ne.s32.totalorder %s580_s18, %s645_s19  ;;  %p651_p10 = scmp.lt.s32.totalorder %s645_s19, %s645_s19 }
  0x18   :  { %v720_v14 = vmin.f32 %v55_v10, 4096.0  ;;  %v728_v20 = vmin.f32 %v56_v15, 4096.0 }
  0x19   :  { %v77_v17 = vshra.s32 %v716_v12, 23  ;;  %v78_v18 = vshra.s32 %v718_v13, 23  ;;  %v744_v36 = vmin.f32 %v57_v25, 4096.0  ;;  %v754_v41 = vmul.f32 2.0, %v716_v12  ;;  %p652_p11 = por %p651_p10, %p650_p9 }
  0x1a   :  { %v79_v19 = vshra.s32 %v720_v14, 23  ;;  %v80_v24 = vshra.s32 %v728_v20, 23  ;;  %v759_v43 = vmul.f32 2.0, %v718_v13  ;;  %v767_v49 = vmul.f32 2.0, %v720_v14 }
  0x1b   :  { %v85_v21 = vand.u32 255, %v77_v17  ;;  %v86_v22 = vand.u32 255, %v78_v18  ;;  %v81_v50 = vshra.s32 %v744_v36, 23  ;;  %v58_v51 = vmax.f32 %v50_v37, 0.00024414063  ;;  %p653_p12 = pnand %p652_p11, %p646_p8 }
  0x1c   :  { %v87_v23 = vand.u32 255, %v79_v19  ;;  %v88_v35 = vand.u32 255, %v80_v24  ;;  %v672_v24 = vmov 1  }
  0x1d   :  { %v588_v26 = vadd.s32 4294967169, %v85_v21  ;;  %v589_v27 = vadd.s32 4294967169, %v86_v22 }
  0x1e   :  { %v735_v29 = vadd.s32 4294967169, %v87_v23  ;;  %v591_v55 = vadd.s32 4294967169, %v88_v35 }
  0x1f   :  { %v738_v31 = vshra.s32 %v588_v26, 1  ;;  %v741_v33 = vshra.s32 %v589_v27, 1 }
  0x20   :  { %v751_v40 = vshra.s32 %v735_v29, 1  ;;  %v793_v21 = vshra.s32 %v591_v55, 1 }
  0x21   :  { %vm125_vm0 = vcmp.ge.s32.totalorder %v738_v31, 0  ;;  %v133_v38 = vadd.s32 2, %v738_v31  ;;  %v141_v39 = vsub.s32 1, %v738_v31  ;;  %vm126_vm1 = vcmp.ge.s32.totalorder %v741_v33, 0 }
  0x22   :  { %v134_v42 = vadd.s32 2, %v741_v33  ;;  %v109_v44 = vshll.u32 %v738_v31, 1  ;;  %v110_v46 = vshll.u32 %v741_v33, 1  ;;  %v142_v47 = vsub.s32 1, %v741_v33 }
  0x23   :  { %v149_v45 = vsel %vm125_vm0, %v133_v38, %v141_v39  ;;  %v135_v53 = vadd.s32 2, %v751_v40  ;;  %v143_v54 = vsub.s32 1, %v751_v40  ;;  %vm127_vm3 = vcmp.ge.s32.totalorder %v751_v40, 0 }
  0x24   :  { %v764_v48 = vsub.s32 7, %v149_v45  ;;  %v150_v52 = vsel %vm126_vm1, %v134_v42, %v142_v47  ;;  %v117_v58 = vsub.s32 %v588_v26, %v109_v44  ;;  %v317_v60 = vmul.u32 2, %v738_v31 }
  0x25   :  { %v778_v57 = vsub.s32 7, %v150_v52  ;;  %v118_v61 = vsub.s32 %v589_v27, %v110_v46  ;;  %v111_v63 = vshll.u32 %v751_v40, 1  ;;  %v151_v10 = vsel %vm127_vm3, %v135_v53, %v143_v54 }
  0x26   :  { %v775_v56 = vadd.s32 4294967295, %v764_v48  ;;  %vm261_vm2 = vcmp.gt.s32.totalorder %v764_v48, 0  ;;  %v796_v31 = vsub.s32 7, %v151_v10  ;;  %v112_v35 = vshll.u32 %v793_v21, 1 }
  0x27   :  { %v262_v59 = vsel %vm261_vm2, %v764_v48, 0  ;;  %v785_v62 = vadd.s32 4294967295, %v778_v57  ;;  %vm263_vm6 = vcmp.gt.s32.totalorder %v778_v57, 0  ;;  %v318_v45 = vmul.u32 2, %v741_v33 }
  0x28   :  { %vm173_vm4 = vcmp.gt.s32.totalorder %v775_v56, 0  ;;  %vm277_vm5 = vcmp.lt.s32.totalorder %v262_v59, 1  ;;  %v264_v17 = vsel %vm263_vm6, %v778_v57, 0  ;;  %v802_v46 = vadd.s32 4294967295, %v796_v31 }
  0x29   :  { %v174_v7 = vsel %vm173_vm4, %v775_v56, 0  ;;  %v278_v8 = vsel %vm277_vm5, %v262_v59, 1  ;;  %vm175_vm8 = vcmp.gt.s32.totalorder %v785_v62, 0  ;;  %vm279_vm9 = vcmp.lt.s32.totalorder %v264_v17, 1 }
  0x2a   :  { %vm189_vm7 = vcmp.lt.s32.totalorder %v174_v7, 23  ;;  %v293_v15 = vsub.s32 1, %v278_v8  ;;  %v176_v19 = vsel %vm175_vm8, %v785_v62, 0  ;;  %v280_v27 = vsel %vm279_vm9, %v264_v17, 1 }
  0x2b   :  { %v190_v18 = vsel %vm189_vm7, %v174_v7, 23  ;;  %vm191_vm10 = vcmp.lt.s32.totalorder %v176_v19, 23  ;;  %v294_v44 = vsub.s32 1, %v280_v27  ;;  %v804_v47 = vand.u32 255, %v81_v50 }
  0x2c   :  { %v205_v22 = vsub.s32 23, %v190_v18  ;;  %v301_v23 = vshra.s32 %v117_v58, %v293_v15  ;;  %v389_v25 = vshll.u32 %v672_v24, %v293_v15  ;;  %v192_v26 = vsel %vm191_vm10, %v176_v19, 23 }
  0x2d   :  { %v206_v42 = vsub.s32 23, %v192_v26  ;;  %v806_v52 = vmin.f32 %v58_v51, 4096.0  ;;  %v119_v58 = vsub.s32 %v735_v29, %v111_v63  ;;  %v319_v59 = vmul.u32 2, %v751_v40 }
  0x2e   :  { %v213_v38 = vshll.u32 %v672_v24, %v205_v22  ;;  %v309_v39 = vshll.u32 %v301_v23, %v293_v15  ;;  %v302_v7 = vshra.s32 %v118_v61, %v294_v44  ;;  %vm177_vm11 = vcmp.gt.s32.totalorder %v802_v46, 0 }
  0x2f   :  { %vm265_vm12 = vcmp.gt.s32.totalorder %v796_v31, 0  ;;  %v812_v8 = vsub.s32 %v591_v55, %v112_v35  ;;  %v214_v51 = vshll.u32 %v672_v24, %v206_v42  ;;  %v178_v29 = vsel %vm177_vm11, %v802_v46, 0 }
  0x30   :  { %v221_v53 = vshra.s32 %v213_v38, 1  ;;  %v325_v54 = vadd.s32 %v317_v60, %v309_v39  ;;  %v814_v33 = vadd.s32 4294967295, %v213_v38  ;;  %v310_v15 = vshll.u32 %v302_v7, %v294_v44 }
  0x31   :  { %v390_v60 = vshll.u32 %v672_v24, %v294_v44  ;;  %v266_v63 = vsel %vm265_vm12, %v796_v31, 0  ;;  %vm501_vm0 = vcmp.ge.s32.totalorder %v775_v56, 0  ;;  %vm193_vm1 = vcmp.lt.s32.totalorder %v178_v29, 23 }
  0x32   :  { %vm333_vm13 = vcmp.gt.s32.totalorder %v325_v54, 4294967170  ;;  %v397_v50 = vadd.s32 %v389_v25, %v325_v54  ;;  %v245_v61 = vadd.s32 %v221_v53, %v716_v12  ;;  %v326_v18 = vadd.s32 %v318_v45, %v310_v15 }
  0x33   :  { %v334_v10 = vsel %vm333_vm13, %v325_v54, 4294967170  ;;  %vm517_vm3 = vcmp.lt.s32.totalorder %v764_v48, 0  ;;  %v222_v22 = vshra.s32 %v214_v51, 1  ;;  %v194_v23 = vsel %vm193_vm1, %v178_v29, 23 }
  0x34   :  { %vm349_vm14 = vcmp.lt.s32.totalorder %v334_v10, 127  ;;  %vm405_vm15 = vcmp.gt.s32.totalorder %v397_v50, 4294967170  ;;  %vm335_vm4 = vcmp.gt.s32.totalorder %v326_v18, 4294967170  ;;  %v398_v26 = vadd.s32 %v390_v60, %v326_v18 }
  0x35   :  { %v350_v55 = vsel %vm349_vm14, %v334_v10, 127  ;;  %v406_v17 = vsel %vm405_vm15, %v397_v50, 4294967170  ;;  %v207_v12 = vsub.s32 23, %v194_v23  ;;  %v336_v38 = vsel %vm335_vm4, %v326_v18, 4294967170 }
  0x36   :  { %v365_v19 = vadd.s32 127, %v350_v55  ;;  %vm421_vm2 = vcmp.lt.s32.totalorder %v406_v17, 127  ;;  %vm281_vm5 = vcmp.lt.s32.totalorder %v266_v63, 1  ;;  %vm825_vm6 = vcmp.eq.f32.partialorder %v45_v3, 0.0 }
  0x37   :  { %v422_v25 = vsel %vm421_vm2, %v406_v17, 127  ;;  %vm351_vm7 = vcmp.lt.s32.totalorder %v336_v38, 127  ;;  %vm407_vm8 = vcmp.gt.s32.totalorder %v398_v26, 4294967170  ;;  %v215_v42 = vshll.u32 %v672_v24, %v207_v12 }
  0x38   :  { %v373_v27 = vshll.u32 %v365_v19, 23  ;;  %v437_v35 = vadd.s32 127, %v422_v25  ;;  %v282_v44 = vsel %vm281_vm5, %v266_v63, 1  ;;  %v352_v53 = vsel %vm351_vm7, %v336_v38, 127 }
  0x39   :  { %v408_v54 = vsel %vm407_vm8, %v398_v26, 4294967170  ;;  %vm502_vm9 = vcmp.ge.s32.totalorder %v785_v62, 0  ;;  %v295_v7 = vsub.s32 1, %v282_v44  ;;  %v605_v50 = vadd.s32 4294967295, %v214_v51 }
  0x3a   :  { %v445_v45 = vshll.u32 %v437_v35, 23  ;;  %v246_v10 = vadd.s32 %v222_v22, %v718_v13  ;;  %v366_v15 = vadd.s32 127, %v352_v53  ;;  %vm423_vm10 = vcmp.lt.s32.totalorder %v408_v54, 127 }
  0x3b   :  { %vm518_vm11 = vcmp.lt.s32.totalorder %v778_v57, 0  ;;  %v612_v3 = vandn.u32 %v245_v61, %v814_v33  ;;  %v424_v29 = vsel %vm423_vm10, %v408_v54, 127  ;;  %v303_v55 = vshra.s32 %v119_v58, %v295_v7 }
  0x3c   :  { %v469_v60 = vadd.f32 %v445_v45, %v373_v27  ;;  %v374_v17 = vshll.u32 %v366_v15, 23  ;;  %v438_v63 = vadd.s32 127, %v424_v29  ;;  %v223_v18 = vshra.s32 %v215_v42, 1 }
  0x3d   :  { %v391_v19 = vshll.u32 %v672_v24, %v295_v7  ;;  %vm838_vm13 = vcmp.eq.f32.partialorder %v46_v4, 0.0  ;;  %v311_v51 = vshll.u32 %v303_v55, %v295_v7  ;;  %vm128_vm14 = vcmp.ge.s32.totalorder %v793_v21, 0 }
  0x3e   :  { %vm477_vm12 = vcmp.lt.f32.partialorder %v754_v41, %v469_v60  ;;  %v136_v33 = vadd.s32 2, %v793_v21  ;;  %v613_v58 = vandn.u32 %v246_v10, %v605_v50  ;;  %v446_v22 = vshll.u32 %v438_v63, 23 }
  0x3f   :  { %v485_v61 = vsel %vm477_vm12, %v373_v27, %v445_v45  ;;  %v144_v23 = vsub.s32 1, %v793_v21  ;;  %v847_v41 = vadd.s32 4294967295, %v215_v42  ;;  %v327_v4 = vadd.s32 %v319_v59, %v311_v51 }
  0x40   :  { %v509_v25 = vsel %vm501_vm0, %v612_v3, %v485_v61  ;;  %v852_v26 = vadd.s32 4294967169, %v804_v47  ;;  %v470_v35 = vadd.f32 %v446_v22, %v374_v17  ;;  %v857_v27 = vadd.s32 %v223_v18, %v720_v14  ;;  %v893_v61 = vld [vmem:[#allocation2 + $0x30] sm:$0xff] }
  0x41   :  { %v525_v12 = vsel %vm517_vm3, 1166016512, %v509_v25  ;;  %v152_v38 = vsel %vm128_vm14, %v136_v33, %v144_v23  ;;  %vm337_vm15 = vcmp.gt.s32.totalorder %v327_v4, 4294967170  ;;  %v399_v42 = vadd.s32 %v391_v19, %v327_v4 }
  0x42   :  { %v533_v56 = vor.u32 %v525_v12, %v37_v30  ;;  %v861_v44 = vsub.s32 7, %v152_v38  ;;  %vm478_vm0 = vcmp.lt.f32.partialorder %v759_v43, %v470_v35  ;;  %v338_v40 = vsel %vm337_vm15, %v327_v4, 4294967170 }
  0x43   :  { %v865_v47 = vshra.s32 %v852_v26, 1  ;;  %v82_v48 = vshra.s32 %v806_v52, 23  ;;  %v486_v59 = vsel %vm478_vm0, %v374_v17, %v446_v22  ;;  %vm353_vm1 = vcmp.lt.s32.totalorder %v338_v40, 127 }
  0x44   :  { %v557_v14 = vsel %vm825_vm6, 0.0, %v533_v56  ;;  %vm409_vm2 = vcmp.gt.s32.totalorder %v399_v42, 4294967170  ;;  %v510_v0 = vsel %vm502_vm9, %v613_v58, %v486_v59  ;;  %v354_v30 = vsel %vm353_vm1, %v338_v40, 127 }
  0x45   :  { %565 = vst [vmem:[#allocation5] sm:$0xff] %v557_v14  ;;  %v410_v45 = vsel %vm409_vm2, %v399_v42, 4294967170  ;;  %v873_v43 = vadd.s32 4294967295, %v861_v44  ;;  %v526_v53 = vsel %vm518_vm11, 1166016512, %v510_v0  ;;  %v367_v54 = vadd.s32 127, %v354_v30 }
  0x46   :  { %vm425_vm3 = vcmp.lt.s32.totalorder %v410_v45, 127  ;;  %vm267_vm4 = vcmp.gt.s32.totalorder %v861_v44, 0  ;;  %v534_v39 = vor.u32 %v526_v53, %v38_v32  ;;  %v614_v3 = vandn.u32 %v857_v27, %v847_v41 }
  0x47   :  { %v426_v7 = vsel %vm425_vm3, %v410_v45, 127  ;;  %vm179_vm5 = vcmp.gt.s32.totalorder %v873_v43, 0  ;;  %v268_v62 = vsel %vm267_vm4, %v861_v44, 0  ;;  %v375_v50 = vshll.u32 %v367_v54, 23 }
  0x48   :  { %v439_v10 = vadd.s32 127, %v426_v7  ;;  %v180_v15 = vsel %vm179_vm5, %v873_v43, 0  ;;  %vm283_vm6 = vcmp.lt.s32.totalorder %v268_v62, 1  ;;  %v558_v57 = vsel %vm838_vm13, 0.0, %v534_v39 }
  0x49   :  { %vm195_vm7 = vcmp.lt.s32.totalorder %v180_v15, 23  ;;  %v284_v60 = vsel %vm283_vm6, %v268_v62, 1  ;;  %566 = vst [vmem:[#allocation5 + $0x8] sm:$0xff] %v558_v57  ;;  %v320_v55 = vmul.u32 2, %v793_v21  ;;  %vm129_vm8 = vcmp.ge.s32.totalorder %v865_v47, 0 }
  0x4a   :  { %v447_v1 = vshll.u32 %v439_v10, 23  ;;  %v196_v32 = vsel %vm195_vm7, %v180_v15, 23  ;;  %v296_v29 = vsub.s32 1, %v284_v60  ;;  %v137_v63 = vadd.s32 2, %v865_v47 }
  0x4b   :  { %v208_v17 = vsub.s32 23, %v196_v32  ;;  %v90_v18 = vand.u32 255, %v82_v48  ;;  %v113_v51 = vshll.u32 %v865_v47, 1  ;;  %v145_v33 = vsub.s32 1, %v865_v47 }
  0x4c   :  { %v471_v19 = vadd.f32 %v447_v1, %v375_v50  ;;  %v304_v13 = vshra.s32 %v812_v8, %v296_v29  ;;  %vm503_vm9 = vcmp.ge.s32.totalorder %v802_v46, 0  ;;  %vm519_vm10 = vcmp.lt.s32.totalorder %v796_v31, 0 }
  0x4d   :  { %vm899_vm11 = vcmp.eq.f32.partialorder %v47_v5, 0.0  ;;  %v216_v58 = vshll.u32 %v672_v24, %v208_v17  ;;  %v392_v22 = vshll.u32 %v672_v24, %v296_v29  ;;  %v153_v23 = vsel %vm129_vm8, %v137_v63, %v145_v33 }
  0x4e   :  { %vm479_vm12 = vcmp.lt.f32.partialorder %v767_v49, %v471_v19  ;;  %v312_v8 = vshll.u32 %v304_v13, %v296_v29  ;;  %v906_v41 = vsub.s32 7, %v153_v23  ;;  %v908_v46 = vadd.s32 4294967169, %v90_v18 }
  0x4f   :  { %v487_v25 = vsel %vm479_vm12, %v375_v50, %v447_v1  ;;  %v51_v31 = vand.u32 2147483647, %v893_v61  ;;  %v121_v12 = vsub.s32 %v852_v26, %v113_v51  ;;  %v321_v35 = vmul.u32 2, %v865_v47 }
  0x50   :  { %v511_v4 = vsel %vm503_vm9, %v614_v3, %v487_v25  ;;  %v328_v5 = vadd.s32 %v320_v55, %v312_v8  ;;  %v224_v38 = vshra.s32 %v216_v58, 1  ;;  %v914_v49 = vadd.s32 4294967295, %v906_v41 }
  0x51   :  { %v527_v27 = vsel %vm519_vm10, 1166016512, %v511_v4  ;;  %vm269_vm13 = vcmp.gt.s32.totalorder %v906_v41, 0  ;;  %v922_v26 = vshra.s32 %v908_v46, 1  ;;  %v607_v53 = vadd.s32 4294967295, %v216_v58 }
  0x52   :  { %v535_v56 = vor.u32 %v527_v27, %v39_v34  ;;  %vm339_vm14 = vcmp.gt.s32.totalorder %v328_v5, 4294967170  ;;  %v400_v42 = vadd.s32 %v392_v22, %v328_v5  ;;  %v270_v40 = vsel %vm269_vm13, %v906_v41, 0 }
  0x53   :  { %v340_v48 = vsel %vm339_vm14, %v328_v5, 4294967170  ;;  %vm181_vm15 = vcmp.gt.s32.totalorder %v914_v49, 0  ;;  %vm285_vm0 = vcmp.lt.s32.totalorder %v270_v40, 1  ;;  %v59_v7 = vmax.f32 %v51_v31, 0.00024414063 }
  0x54   :  { %v559_v47 = vsel %vm899_vm11, 0.0, %v535_v56  ;;  %vm355_vm1 = vcmp.lt.s32.totalorder %v340_v48, 127  ;;  %vm411_vm2 = vcmp.gt.s32.totalorder %v400_v42, 4294967170  ;;  %v182_v14 = vsel %vm181_vm15, %v914_v49, 0 }
  0x55   :  { %567 = vst [vmem:[#allocation5 + $0x10] sm:$0xff] %v559_v47  ;;  %v356_v2 = vsel %vm355_vm1, %v340_v48, 127  ;;  %v412_v34 = vsel %vm411_vm2, %v400_v42, 4294967170  ;;  %vm197_vm3 = vcmp.lt.s32.totalorder %v182_v14, 23  ;;  %v286_v59 = vsel %vm285_vm0, %v270_v40, 1  ;;  %v963_v48 = vld [vmem:[#allocation2 + $0x38] sm:$0xff] }
  0x56   :  { %v368_v0 = vadd.s32 127, %v356_v2  ;;  %vm427_vm4 = vcmp.lt.s32.totalorder %v412_v34, 127  ;;  %v198_v30 = vsel %vm197_vm3, %v182_v14, 23  ;;  %v297_v45 = vsub.s32 1, %v286_v59 }
  0x57   :  { %v428_v54 = vsel %vm427_vm4, %v412_v34, 127  ;;  %v209_v39 = vsub.s32 23, %v198_v30  ;;  %v248_v62 = vadd.s32 %v224_v38, %v728_v20  ;;  %v464_v57 = vmul.f32 2.0, %v728_v20 }
  0x58   :  { %v376_v50 = vshll.u32 %v368_v0, 23  ;;  %v440_v10 = vadd.s32 127, %v428_v54  ;;  %v305_v15 = vshra.s32 %v121_v12, %v297_v45  ;;  %vm130_vm5 = vcmp.ge.s32.totalorder %v922_v26, 0 }
  0x59   :  { %v217_v3 = vshll.u32 %v672_v24, %v209_v39  ;;  %v138_v60 = vadd.s32 2, %v922_v26  ;;  %v393_v29 = vshll.u32 %v672_v24, %v297_v45  ;;  %v146_v55 = vsub.s32 1, %v922_v26 }
  0x5a   :  { %v448_v1 = vshll.u32 %v440_v10, 23  ;;  %v313_v32 = vshll.u32 %v305_v15, %v297_v45  ;;  %v40_v17 = vand.u32 2147483648, %v705_v6  ;;  %vm504_vm6 = vcmp.ge.s32.totalorder %v873_v43, 0 }
  0x5b   :  { %vm940_vm7 = vcmp.eq.f32.partialorder %v48_v11, 0.0  ;;  %v944_v63 = vmin.f32 %v59_v7, 4096.0  ;;  %v615_v18 = vandn.u32 %v248_v62, %v607_v53  ;;  %v154_v51 = vsel %vm130_vm5, %v138_v60, %v146_v55 }
  0x5c   :  { %v472_v19 = vadd.f32 %v448_v1, %v376_v50  ;;  %v329_v13 = vadd.s32 %v321_v35, %v313_v32  ;;  %vm520_vm8 = vcmp.lt.s32.totalorder %v861_v44, 0  ;;  %v225_v33 = vshra.s32 %v217_v3, 1 }
  0x5d   :  { %v114_v21 = vshll.u32 %v922_v26, 1  ;;  %v948_v58 = vsub.s32 7, %v154_v51  ;;  %v608_v8 = vadd.s32 4294967295, %v217_v3  ;;  %v83_v25 = vshra.s32 %v944_v63, 23 }
  0x5e   :  { %vm480_vm9 = vcmp.lt.f32.partialorder %v464_v57, %v472_v19  ;;  %vm341_vm10 = vcmp.gt.s32.totalorder %v329_v13, 4294967170  ;;  %v401_v6 = vadd.s32 %v393_v29, %v329_v13  ;;  %v249_v42 = vadd.s32 %v225_v33, %v744_v36 }
  0x5f   :  { %v488_v11 = vsel %vm480_vm9, %v376_v50, %v448_v1  ;;  %v342_v22 = vsel %vm341_vm10, %v329_v13, 4294967170  ;;  %v951_v23 = vadd.s32 4294967295, %v948_v58  ;;  %vm271_vm13 = vcmp.gt.s32.totalorder %v948_v58, 0 }
  0x60   :  { %v512_v4 = vsel %vm504_vm6, %v615_v18, %v488_v11  ;;  %vm357_vm11 = vcmp.lt.s32.totalorder %v342_v22, 127  ;;  %vm413_vm12 = vcmp.gt.s32.totalorder %v401_v6, 4294967170  ;;  %v272_v40 = vsel %vm271_vm13, %v948_v58, 0 }
  0x61   :  { %v528_v5 = vsel %vm520_vm8, 1166016512, %v512_v4  ;;  %v358_v12 = vsel %vm357_vm11, %v342_v22, 127  ;;  %v414_v35 = vsel %vm413_vm12, %v401_v6, 4294967170  ;;  %vm183_vm14 = vcmp.gt.s32.totalorder %v951_v23, 0 }
  0x62   :  { %v536_v27 = vor.u32 %v528_v5, %v40_v17  ;;  %v369_v38 = vadd.s32 127, %v358_v12  ;;  %vm429_vm15 = vcmp.lt.s32.totalorder %v414_v35, 127  ;;  %v184_v56 = vsel %vm183_vm14, %v951_v23, 0 }
  0x63   :  { %v430_v43 = vsel %vm429_vm15, %v414_v35, 127  ;;  %vm199_vm0 = vcmp.lt.s32.totalorder %v184_v56, 23  ;;  %v122_v34 = vsub.s32 %v908_v46, %v114_v21  ;;  %vm287_vm1 = vcmp.lt.s32.totalorder %v272_v40, 1 }
  0x64   :  { %v560_v44 = vsel %vm940_vm7, 0.0, %v536_v27  ;;  %v377_v47 = vshll.u32 %v369_v38, 23  ;;  %v441_v14 = vadd.s32 127, %v430_v43  ;;  %v200_v2 = vsel %vm199_vm0, %v184_v56, 23 }
  0x65   :  { %568 = vst [vmem:[#allocation5 + $0x18] sm:$0xff] %v560_v44  ;;  %v91_v59 = vand.u32 255, %v83_v25  ;;  %v465_v30 = vmul.f32 2.0, %v744_v36  ;;  %v288_v45 = vsel %vm287_vm1, %v272_v40, 1  ;;  %v52_v53 = vand.u32 2147483647, %v963_v48 }
  0x66   :  { %v449_v0 = vshll.u32 %v441_v14, 23  ;;  %v210_v54 = vsub.s32 23, %v200_v2  ;;  %v298_v39 = vsub.s32 1, %v288_v45  ;;  %v616_v62 = vandn.u32 %v249_v42, %v608_v8 }
  0x67   :  { %v594_v7 = vadd.s32 4294967169, %v91_v59  ;;  %v60_v10 = vmax.f32 %v52_v53, 0.00024414063  ;;  %v41_v15 = vand.u32 2147483648, %v711_v9  ;;  %vm505_vm2 = vcmp.ge.s32.totalorder %v914_v49, 0 }
  0x68   :  { %v473_v50 = vadd.f32 %v449_v0, %v377_v47  ;;  %v306_v46 = vshra.s32 %v122_v34, %v298_v39  ;;  %v322_v57 = vmul.u32 2, %v922_v26  ;;  %vm521_vm4 = vcmp.lt.s32.totalorder %v906_v41, 0 }
  0x69   :  { %v976_v36 = vshra.s32 %v594_v7, 1  ;;  %v978_v3 = vmin.f32 %v60_v10, 4096.0  ;;  %v218_v1 = vshll.u32 %v672_v24, %v210_v54  ;;  %v394_v29 = vshll.u32 %v672_v24, %v298_v39 }
  0x6a   :  { %vm481_vm3 = vcmp.lt.f32.partialorder %v465_v30, %v473_v50  ;;  %v314_v32 = vshll.u32 %v306_v46, %v298_v39  ;;  %vm553_vm6 = vcmp.eq.f32.partialorder %v49_v16, 0.0  ;;  %v466_v14 = vmul.f32 2.0, %v806_v52 }
  0x6b   :  { %v489_v60 = vsel %vm481_vm3, %v377_v47, %v449_v0  ;;  %vm131_vm5 = vcmp.ge.s32.totalorder %v976_v36, 0  ;;  %v139_v49 = vadd.s32 2, %v976_v36  ;;  %v147_v26 = vsub.s32 1, %v976_v36 }
  0x6c   :  { %v513_v55 = vsel %vm505_vm2, %v616_v62, %v489_v60  ;;  %v330_v41 = vadd.s32 %v322_v57, %v314_v32  ;;  %v84_v18 = vshra.s32 %v978_v3, 23  ;;  %v226_v19 = vshra.s32 %v218_v1, 1 }
  0x6d   :  { %v529_v17 = vsel %vm521_vm4, 1166016512, %v513_v55  ;;  %v155_v51 = vsel %vm131_vm5, %v139_v49, %v147_v26  ;;  %v115_v8 = vshll.u32 %v976_v36, 1  ;;  %v609_v11 = vadd.s32 4294967295, %v218_v1 }
  0x6e   :  { %v537_v20 = vor.u32 %v529_v17, %v41_v15  ;;  %vm343_vm7 = vcmp.gt.s32.totalorder %v330_v41, 4294967170  ;;  %v402_v13 = vadd.s32 %v394_v29, %v330_v41  ;;  %v989_v6 = vsub.s32 7, %v155_v51 }
  0x6f   :  { %v344_v21 = vsel %vm343_vm7, %v330_v41, 4294967170  ;;  %v92_v9 = vand.u32 255, %v84_v18  ;;  %v250_v4 = vadd.s32 %v226_v19, %v806_v52  ;;  %v123_v27 = vsub.s32 %v594_v7, %v115_v8 }
  0x70   :  { %v561_v33 = vsel %vm553_vm6, 0.0, %v537_v20  ;;  %vm359_vm8 = vcmp.lt.s32.totalorder %v344_v21, 127  ;;  %vm415_vm9 = vcmp.gt.s32.totalorder %v402_v13, 4294967170  ;;  %v992_v25 = vadd.s32 4294967295, %v989_v6 }
  0x71   :  { %569 = vst [vmem:[#allocation5 + $0x20] sm:$0xff] %v561_v33  ;;  %v360_v16 = vsel %vm359_vm8, %v344_v21, 127  ;;  %v416_v22 = vsel %vm415_vm9, %v402_v13, 4294967170  ;;  %vm273_vm10 = vcmp.gt.s32.totalorder %v989_v6, 0  ;;  %v595_v44 = vadd.s32 4294967169, %v92_v9 }
  0x72   :  { %v370_v5 = vadd.s32 127, %v360_v16  ;;  %vm431_vm11 = vcmp.lt.s32.totalorder %v416_v22, 127  ;;  %v274_v12 = vsel %vm273_vm10, %v989_v6, 0  ;;  %vm185_vm12 = vcmp.gt.s32.totalorder %v992_v25, 0 }
  0x73   :  { %v432_v35 = vsel %vm431_vm11, %v416_v22, 127  ;;  %vm289_vm13 = vcmp.lt.s32.totalorder %v274_v12, 1  ;;  %v186_v42 = vsel %vm185_vm12, %v992_v25, 0  ;;  %v323_v0 = vmul.u32 2, %v976_v36 }
  0x74   :  { %v378_v38 = vshll.u32 %v370_v5, 23  ;;  %v442_v56 = vadd.s32 127, %v432_v35  ;;  %v290_v43 = vsel %vm289_vm13, %v274_v12, 1  ;;  %vm201_vm14 = vcmp.lt.s32.totalorder %v186_v42, 23 }
  0x75   :  { %v299_v40 = vsub.s32 1, %v290_v43  ;;  %v202_v2 = vsel %vm201_vm14, %v186_v42, 23  ;;  %v1001_v30 = vshra.s32 %v595_v44, 1  ;;  %v42_v45 = vand.u32 2147483648, %v733_v28 }
  0x76   :  { %v450_v47 = vshll.u32 %v442_v56, 23  ;;  %v211_v34 = vsub.s32 23, %v202_v2  ;;  %v617_v54 = vandn.u32 %v250_v4, %v609_v11  ;;  %vm506_vm15 = vcmp.ge.s32.totalorder %v951_v23, 0 }
  0x77   :  { %v307_v59 = vshra.s32 %v123_v27, %v299_v40  ;;  %vm522_vm0 = vcmp.lt.s32.totalorder %v948_v58, 0  ;;  %v395_v62 = vshll.u32 %v672_v24, %v299_v40  ;;  %vm132_vm1 = vcmp.ge.s32.totalorder %v1001_v30, 0 }
  0x78   :  { %v474_v39 = vadd.f32 %v450_v47, %v378_v38  ;;  %v219_v52 = vshll.u32 %v672_v24, %v211_v34  ;;  %v140_v50 = vadd.s32 2, %v1001_v30  ;;  %v148_v10 = vsub.s32 1, %v1001_v30 }
  0x79   :  { %v315_v7 = vshll.u32 %v307_v59, %v299_v40  ;;  %vm1013_vm3 = vcmp.eq.f32.partialorder %v50_v37, 0.0  ;;  %v116_v1 = vshll.u32 %v1001_v30, 1  ;;  %v467_v16 = vmul.f32 2.0, %v944_v63 }
  0x7a   :  { %vm482_vm2 = vcmp.lt.f32.partialorder %v466_v14, %v474_v39  ;;  %v156_v58 = vsel %vm132_vm1, %v140_v50, %v148_v10  ;;  %v227_v29 = vshra.s32 %v219_v52, 1  ;;  %v610_v17 = vadd.s32 4294967295, %v219_v52 }
  0x7b   :  { %v490_v15 = vsel %vm482_vm2, %v378_v38, %v450_v47  ;;  %v331_v46 = vadd.s32 %v323_v0, %v315_v7  ;;  %v1018_v49 = vsub.s32 7, %v156_v58  ;;  %v124_v18 = vsub.s32 %v595_v44, %v116_v1 }
  0x7c   :  { %v514_v57 = vsel %vm506_vm15, %v617_v54, %v490_v15  ;;  %v251_v19 = vadd.s32 %v227_v29, %v944_v63  ;;  %v324_v5 = vmul.u32 2, %v1001_v30  ;;  %v43_v56 = vand.u32 2147483648, %v893_v61 }
  0x7d   :  { %v530_v36 = vsel %vm522_vm0, 1166016512, %v514_v57  ;;  %vm345_vm4 = vcmp.gt.s32.totalorder %v331_v46, 4294967170  ;;  %v403_v60 = vadd.s32 %v395_v62, %v331_v46  ;;  %v1023_v26 = vadd.s32 4294967295, %v1018_v49 }
  0x7e   :  { %v538_v32 = vor.u32 %v530_v36, %v42_v45  ;;  %v346_v55 = vsel %vm345_vm4, %v331_v46, 4294967170  ;;  %vm275_vm8 = vcmp.gt.s32.totalorder %v1018_v49, 0  ;;  %v618_v12 = vandn.u32 %v251_v19, %v610_v17 }
  0x7f   :  { %vm361_vm5 = vcmp.lt.s32.totalorder %v346_v55, 127  ;;  %vm417_vm6 = vcmp.gt.s32.totalorder %v403_v60, 4294967170  ;;  %vm187_vm9 = vcmp.gt.s32.totalorder %v1023_v26, 0  ;;  %v276_v51 = vsel %vm275_vm8, %v1018_v49, 0 }
  0x80   :  { %v562_v28 = vsel %vm1013_vm3, 0.0, %v538_v32  ;;  %v362_v37 = vsel %vm361_vm5, %v346_v55, 127  ;;  %v418_v41 = vsel %vm417_vm6, %v403_v60, 4294967170  ;;  %v188_v8 = vsel %vm187_vm9, %v1023_v26, 0 }
  0x81   :  { %570 = vst [vmem:[#allocation5 + $0x28] sm:$0xff] %v562_v28  ;;  %v371_v20 = vadd.s32 127, %v362_v37  ;;  %vm433_vm7 = vcmp.lt.s32.totalorder %v418_v41, 127  ;;  %vm291_vm10 = vcmp.lt.s32.totalorder %v276_v51, 1  ;;  %vm203_vm11 = vcmp.lt.s32.totalorder %v188_v8, 23 }
  0x82   :  { %v434_v13 = vsel %vm433_vm7, %v418_v41, 127  ;;  %v292_v11 = vsel %vm291_vm10, %v276_v51, 1  ;;  %v204_v22 = vsel %vm203_vm11, %v188_v8, 23  ;;  %vm507_vm12 = vcmp.ge.s32.totalorder %v992_v25, 0 }
  0x83   :  { %v379_v33 = vshll.u32 %v371_v20, 23  ;;  %v443_v21 = vadd.s32 127, %v434_v13  ;;  %v300_v4 = vsub.s32 1, %v292_v11  ;;  %v212_v27 = vsub.s32 23, %v204_v22 }
  0x84   :  { %vm523_vm14 = vcmp.lt.s32.totalorder %v989_v6, 0  ;;  %vm555_vm15 = vcmp.eq.f32.partialorder %v51_v31, 0.0  ;;  %v468_v62 = vmul.f32 2.0, %v978_v3  ;;  %vm508_vm4 = vcmp.ge.s32.totalorder %v1023_v26, 0 }
  0x85   :  { %v451_v9 = vshll.u32 %v443_v21, 23  ;;  %v308_v38 = vshra.s32 %v124_v18, %v300_v4  ;;  %v396_v43 = vshll.u32 %v672_v24, %v300_v4  ;;  %v220_v44 = vshll.u32 %v672_v24, %v212_v27 }
  0x86   :  { %v44_v10 = vand.u32 2147483648, %v963_v48  ;;  %vm524_vm6 = vcmp.lt.s32.totalorder %v1018_v49, 0  ;;  %vm556_vm7 = vcmp.eq.f32.partialorder %v52_v53, 0.0 }
  0x87   :  { %v475_v35 = vadd.f32 %v451_v9, %v379_v33  ;;  %v316_v42 = vshll.u32 %v308_v38, %v300_v4  ;;  %v228_v0 = vshra.s32 %v220_v44, 1  ;;  %v611_v24 = vadd.s32 4294967295, %v220_v44 }
  0x89   :  { %vm483_vm13 = vcmp.lt.f32.partialorder %v467_v16, %v475_v35  ;;  %v332_v47 = vadd.s32 %v324_v5, %v316_v42  ;;  %v252_v39 = vadd.s32 %v228_v0, %v978_v3 }
  0x8a   :  { %v491_v40 = vsel %vm483_vm13, %v379_v33, %v451_v9 }
  0x8b   :  { %v515_v63 = vsel %vm507_vm12, %v618_v12, %v491_v40  ;;  %vm347_vm0 = vcmp.gt.s32.totalorder %v332_v47, 4294967170  ;;  %v404_v34 = vadd.s32 %v396_v43, %v332_v47  ;;  %v619_v52 = vandn.u32 %v252_v39, %v611_v24 }
  0x8c   :  { %v531_v14 = vsel %vm523_vm14, 1166016512, %v515_v63  ;;  %v348_v59 = vsel %vm347_vm0, %v332_v47, 4294967170 }
  0x8d   :  { %v539_v2 = vor.u32 %v531_v14, %v43_v56  ;;  %vm363_vm1 = vcmp.lt.s32.totalorder %v348_v59, 127  ;;  %vm419_vm2 = vcmp.gt.s32.totalorder %v404_v34, 4294967170 }
  0x8e   :  { %v364_v6 = vsel %vm363_vm1, %v348_v59, 127  ;;  %v420_v30 = vsel %vm419_vm2, %v404_v34, 4294967170 }
  0x8f   :  { %v563_v25 = vsel %vm555_vm15, 0.0, %v539_v2  ;;  %v372_v45 = vadd.s32 127, %v364_v6  ;;  %vm435_vm3 = vcmp.lt.s32.totalorder %v420_v30, 127 }
  0x90   :  { %571 = vst [vmem:[#allocation5 + $0x30] sm:$0xff] %v563_v25  ;;  %v436_v54 = vsel %vm435_vm3, %v420_v30, 127 }
  0x91   :  { %v380_v7 = vshll.u32 %v372_v45, 23  ;;  %v444_v61 = vadd.s32 127, %v436_v54 }
  0x93   :  { %v452_v31 = vshll.u32 %v444_v61, 23 }
  0x95   :  { %v476_v50 = vadd.f32 %v452_v31, %v380_v7 }
  0x97   :  { %vm484_vm5 = vcmp.lt.f32.partialorder %v468_v62, %v476_v50 }
  0x98   :  { %v492_v15 = vsel %vm484_vm5, %v380_v7, %v452_v31 }
  0x99   :  { %v516_v46 = vsel %vm508_vm4, %v619_v52, %v492_v15 }
  0x9a   :  { %v532_v57 = vsel %vm524_vm6, 1166016512, %v516_v46 }
  0x9b   :  { %v540_v23 = vor.u32 %v532_v57, %v44_v10 }
  0x9d   :  { %v564_v3 = vsel %vm556_vm7, 0.0, %v540_v23 }
  0x9e   :  { %572 = vst [vmem:[#allocation5 + $0x38] sm:$0xff] %v564_v3 }
  0x9f   :  { %656 = shalt.err (!%p653_p12)
}
  0xa0   :  { %s657_s22 = scalar_lea.hbm %s1059_s1, 1024 }
  0xa1   :  { %p658_p13 = scmp.ne.s32.totalorder %s1059_s1, %s657_s22  ;;  %p661_p0 = scmp.lt.u32.totalorder %s657_s22, %s1059_s1 }
  0xa3   :  { %p663_p1 = pnand %p661_p0, %p658_p13 }
  0xa5   :  { %666 = shalt.err (!%p663_p1)
}
  0xa6   :  { %582 = dma.vmem_to_hbm [thread:$0]  %s580_s18, 1024, %s1059_s1, [#allocation4]  }
  0xa7   :  { %669 = dma.done.wait [#allocation4], 1024  }
  0xa8   :  { %670 = vsyncadd [#allocation4], 4294966272 }
  0xa9   :  { %586 = vsyncpa [#allocation3], 1 }
  0xaa   :  { %587 = vsyncpa [#allocation4], 1 }

</bundles_post_ra>
